<compile_context>
chip_gen: v5e
topology: v5e:2x2
jax: 0.10.0
libtpu: 0.0.40
codegen_flags: <defaults>
</compile_context>

<pallas_src>
import functools
import math

import jax
import jax.numpy as jnp
from jax.experimental import pallas as pl
from jax.experimental.pallas import tpu as pltpu


def _learnable_embedding_kernel(x_ref, w_ref, b_ref, o_ref, *, size, k):
    # x_ref: (tile_rows, k) f32   -- k flattened x elements per output row
    # w_ref: (1, k*size)    f32   -- weight row tiled k times, pre-scaled by 1/size
    # b_ref: (1, k*size)    f32   -- bias row tiled k times
    # o_ref: (tile_rows, k*size)
    x = x_ref[...]
    rows = x.shape[0]
    # Expand each x element across its `size` output lanes:
    #   xe[r, j*size + s] = x[r, j]
    xe = jnp.concatenate(
        [jnp.broadcast_to(x[:, j:j + 1], (rows, size)) for j in range(k)],
        axis=1,
    )
    o_ref[...] = (xe * w_ref[...] + b_ref[...]).astype(o_ref.dtype)


def learnable_embedding(x, weight, bias, size, *, out_dtype=jnp.float32,
                        vmem_budget_bytes=24 * 1024 * 1024,
                        max_tile_rows=8192):
    """x: any shape/dtype; weight: (size, 1); bias: (size,).

    Returns out_dtype array of shape (*x.shape, size), matching
    nn.Linear(1, size)(x.unsqueeze(-1).float() / size).
    """
    orig_shape = x.shape
    n = int(math.prod(orig_shape))

    # Fold factor: make output rows lane-dense (last dim a multiple of 128 lanes).
    k = (math.lcm(size, 128) // size) if size < 128 else 1
    lane_w = k * size

    # Rows of the folded (rows, k) x / (rows, lane_w) output layout.
    rows = pl.cdiv(n, k)

    # Tile sizing: double-buffered output row + double-buffered x row
    # (x lane-pads to 128 lanes in VMEM).  Kept under ~24 MiB; 32 MiB scoped
    # limit is safe on v5e (128 MiB phys), v6e (128 MiB) and v7x (64 MiB).
    bytes_per_row = 2 * lane_w * 4 + 2 * 128 * 4
    fit_rows = max(8, (vmem_budget_bytes // bytes_per_row) // 8 * 8)
    max_tile = min(max_tile_rows, fit_rows)
    num_tiles = pl.cdiv(rows, max_tile)
    tile_rows = pl.cdiv(pl.cdiv(rows, num_tiles), 8) * 8   # balanced, multiple of 8
    rows_padded = num_tiles * tile_rows
    n_padded = rows_padded * k

    xf = jnp.ravel(x).astype(jnp.float32)
    if n_padded > n:
        xf = jnp.pad(xf, (0, n_padded - n))
    x2d = xf.reshape(rows_padded, k)

    # Fold the 1/size scale into the (size-element) weight row; tile w/b k times
    # to match the folded lane layout.  (size is typically a power of two, so
    # this is bit-identical to the PyTorch x/size formulation.)
    inv = jnp.float32(1.0) / jnp.float32(size)
    w_row = weight.reshape(1, size).astype(jnp.float32) * inv
    b_row = bias.reshape(1, size).astype(jnp.float32)
    w_tiled = jnp.tile(w_row, (1, k))   # (1, lane_w)
    b_tiled = jnp.tile(b_row, (1, k))   # (1, lane_w)

    kernel = functools.partial(_learnable_embedding_kernel, size=size, k=k)
    out = pl.pallas_call(
        kernel,
        out_shape=jax.ShapeDtypeStruct((rows_padded, lane_w), out_dtype),
        grid_spec=pltpu.PrefetchScalarGridSpec(
            num_scalar_prefetch=0,
            grid=(num_tiles,),
            in_specs=[
                pl.BlockSpec((tile_rows, k), lambda i: (i, 0)),     # x tile
                pl.BlockSpec((1, lane_w), lambda i: (0, 0)),        # weights (resident)
                pl.BlockSpec((1, lane_w), lambda i: (0, 0)),        # bias (resident)
            ],
            out_specs=pl.BlockSpec((tile_rows, lane_w), lambda i: (i, 0)),
        ),
        compiler_params=pltpu.CompilerParams(
            dimension_semantics=("parallel",),        # v7x: shard rows across 2 TCs
            vmem_limit_bytes=32 * 1024 * 1024,
        ),
    )(x2d, w_tiled, b_tiled)

    # Row-major identity: (rows_padded, k*size) flat == (n_padded, size) flat.
    out_flat = out.reshape(-1)[: n * size]
    return out_flat.reshape(*orig_shape, size)


if __name__ == "__main__":
    key = jax.random.PRNGKey(0)
    size = 32          # nn.Linear(1, size)
    B, S = 2, 8        # e.g. a batch of integer timesteps

    k_x, k_w, k_b, k_x2 = jax.random.split(key, 4)
    # Deterministic "parameters" (shapes from nn.Linear(1, size)):
    weight = jax.random.normal(k_w, (size, 1), dtype=jnp.float32) * 0.1
    bias = jax.random.normal(k_b, (size,), dtype=jnp.float32) * 0.1
    # Input: integer-like values (typical use: timestep indices)
    x = jax.random.randint(k_x, (B, S), 0, size).astype(jnp.int32)

    y = learnable_embedding(x, weight, bias, size)
    y = jax.block_until_ready(y)

    # Reference (mirrors the PyTorch forward exactly)
    ref = (x[..., None].astype(jnp.float32) / size) @ weight.T + bias
    assert y.shape == (B, S, size)
    assert jnp.allclose(y, ref, atol=1e-5, rtol=1e-5)

    # Second check: awkward shape (prod not a multiple of anything) -> padding path.
    x2 = jax.random.uniform(k_x2, (5, 3), dtype=jnp.float32) * size
    y2 = jax.block_until_ready(learnable_embedding(x2, weight, bias, size))
    ref2 = (x2[..., None] / size) @ weight.T + bias
    assert y2.shape == (5, 3, size)
    assert jnp.allclose(y2, ref2, atol=1e-5, rtol=1e-5)

    print("KERNEL_OK")
</pallas_src>

<mosaic_0001>
module attributes {stable_mosaic.version = 11 : i64} {
  func.func @_learnable_embedding_kernel(%arg0: i32, %arg1: memref<8x4xf32, #tpu.memory_space<vmem>>, %arg2: memref<1x128xf32, #tpu.memory_space<vmem>>, %arg3: memref<1x128xf32, #tpu.memory_space<vmem>>, %arg4: memref<8x128xf32, #tpu.memory_space<vmem>>) attributes {dimension_semantics = [#tpu.dimension_semantics<parallel>], iteration_bounds = array<i64: 1>, scalar_prefetch = 0 : i64, scratch_operands = 0 : i64, tpu.core_type = #tpu.core_type<tc>, window_params = [{transform_indices = @transform_0, window_bounds = array<i64: 8, 4>}, {pipeline_mode = #tpu.pipeline_mode<synchronous>, transform_indices = @transform_1, window_bounds = array<i64: 1, 128>}, {pipeline_mode = #tpu.pipeline_mode<synchronous>, transform_indices = @transform_2, window_bounds = array<i64: 1, 128>}, {transform_indices = @transform_3, window_bounds = array<i64: 8, 128>}]} {
    %c0 = arith.constant 0 : index
    %c0_0 = arith.constant 0 : index
    %0 = vector.load %arg1[%c0, %c0_0] : memref<8x4xf32, #tpu.memory_space<vmem>>, vector<8x4xf32>
    %1 = vector.extract_strided_slice %0 {offsets = [0, 0], sizes = [8, 1], strides = [1, 1]} : vector<8x4xf32> to vector<8x1xf32>
    %2 = vector.shape_cast %1 : vector<8x1xf32> to vector<8x1xf32>
    %3 = vector.broadcast %2 : vector<8x1xf32> to vector<8x32xf32>
    %4 = vector.extract_strided_slice %0 {offsets = [0, 1], sizes = [8, 1], strides = [1, 1]} : vector<8x4xf32> to vector<8x1xf32>
    %5 = vector.shape_cast %4 : vector<8x1xf32> to vector<8x1xf32>
    %6 = vector.broadcast %5 : vector<8x1xf32> to vector<8x32xf32>
    %7 = vector.extract_strided_slice %0 {offsets = [0, 2], sizes = [8, 1], strides = [1, 1]} : vector<8x4xf32> to vector<8x1xf32>
    %8 = vector.shape_cast %7 : vector<8x1xf32> to vector<8x1xf32>
    %9 = vector.broadcast %8 : vector<8x1xf32> to vector<8x32xf32>
    %10 = vector.extract_strided_slice %0 {offsets = [0, 3], sizes = [8, 1], strides = [1, 1]} : vector<8x4xf32> to vector<8x1xf32>
    %11 = vector.shape_cast %10 : vector<8x1xf32> to vector<8x1xf32>
    %12 = vector.broadcast %11 : vector<8x1xf32> to vector<8x32xf32>
    %13 = tpu.concatenate %3, %6, %9, %12 in 1 : vector<8x32xf32>, vector<8x32xf32>, vector<8x32xf32>, vector<8x32xf32> -> vector<8x128xf32>
    %c0_1 = arith.constant 0 : index
    %c0_2 = arith.constant 0 : index
    %14 = vector.load %arg2[%c0_1, %c0_2] : memref<1x128xf32, #tpu.memory_space<vmem>>, vector<1x128xf32>
    %15 = vector.broadcast %14 : vector<1x128xf32> to vector<8x128xf32>
    %16 = arith.mulf %13, %15 : vector<8x128xf32>
    %c0_3 = arith.constant 0 : index
    %c0_4 = arith.constant 0 : index
    %17 = vector.load %arg3[%c0_3, %c0_4] : memref<1x128xf32, #tpu.memory_space<vmem>>, vector<1x128xf32>
    %18 = vector.broadcast %17 : vector<1x128xf32> to vector<8x128xf32>
    %19 = arith.addf %16, %18 : vector<8x128xf32>
    %c0_5 = arith.constant 0 : index
    %c0_6 = arith.constant 0 : index
    %20 = vector.load %arg4[%c0_5, %c0_6] : memref<8x128xf32, #tpu.memory_space<vmem>>, vector<8x128xf32>
    tpu.vector_store %arg4[%c0_5, %c0_6], %19 {strides = array<i32>} : memref<8x128xf32, #tpu.memory_space<vmem>>, vector<8x128xf32>,
    return
  }
  func.func @transform_0(%arg0: i32) -> (i32, i32) {
    %c0_i32 = arith.constant 0 : i32
    %c0_i32_0 = arith.constant 0 : i32
    return %arg0, %c0_i32 : i32, i32
  }
  func.func @transform_1(%arg0: i32) -> (i32, i32) {
    %c0_i32 = arith.constant 0 : i32
    %c0_i32_0 = arith.constant 0 : i32
    %c0_i32_1 = arith.constant 0 : i32
    return %c0_i32, %c0_i32_0 : i32, i32
  }
  func.func @transform_2(%arg0: i32) -> (i32, i32) {
    %c0_i32 = arith.constant 0 : i32
    %c0_i32_0 = arith.constant 0 : i32
    %c0_i32_1 = arith.constant 0 : i32
    return %c0_i32, %c0_i32_0 : i32, i32
  }
  func.func @transform_3(%arg0: i32) -> (i32, i32) {
    %c0_i32 = arith.constant 0 : i32
    %c0_i32_0 = arith.constant 0 : i32
    return %arg0, %c0_i32 : i32, i32
  }
}

</mosaic_0001>

<bundles_post_ra>
// kernel: tpu_custom_call.1
= control target key start
LH: loop header
LB: loop body
LE: loop exit
PB: predicated region body
PF: predicated region fallthrough
CT: control target
= control target key end

     0   :  { %v104_v1 = vmov 0   ;;  %v105_v2 = vmov 2   ;;  %s141_s0 = inlined_call_operand.vmem [shape: f32[8,4], index: 0, kind: input, shape index: {}]   ;;  %s142_s1 = inlined_call_operand.vmem [shape: f32[1,128], index: 1, kind: input, shape index: {}]   ;;  %s143_s2 = inlined_call_operand.vmem [shape: f32[1,128], index: 2, kind: input, shape index: {}]   ;;  %s144_s3 = inlined_call_operand.hbm [shape: f32[8,128], index: 3, kind: output, shape index: {}]  }
   0x1   :  { %v15_v0 = vld [vmem:[%s141_s0] sm:$0xff]  ;;  %71 = vset.pattern.permute.xlu0 %v104_v1  ;;  %73 = vset.pattern.permute.xlu1 %v105_v2 }
   0x2   :  { %8 = vsyncpa [#allocation3], 0  ;;  %18 = vperm.xlu0 %71, %v15_v0   ;;  %26 = vperm.xlu1 %73, %v15_v0   ;;  %v106_v3 = vmov 1   ;;  %v107_v4 = vmov 3   ;;  %vm33_vm0 = vcmask 261120   ;;  %vm35_vm1 = vcmask 523264  }
   0x3   :  { %vm37_vm2 = vcmask 785408   ;;  %v76_v8 = vld [vmem:[%s142_s1] ss:$0 sm:$0xff]  ;;  %s108_s17 = smov [#allocation2]   ;;  %s57_s21 = sshll.u32 %s144_s3, 4  ;;  %s58_s21 = int_to_ptr.hbm [resolvable:$true] %s57_s21 }
   0x4   :  { %v77_v12 = vld [vmem:[%s143_s2] ss:$0 sm:$0xff]  ;;  %s55_s18 = sshll.u32 %s108_s17, 4  ;;  %s56_s18 = int_to_ptr.vmem [resolvable:$true] %s55_s18 }
   0xa   :  { %72 = vset.pattern.permute.xlu0 %v106_v3  ;;  %74 = vset.pattern.permute.xlu1 %v107_v4 }
   0xb   :  { %22 = vperm.xlu0 %72, %v15_v0   ;;  %30 = vperm.xlu1 %74, %v15_v0  }
  0x13   :  { %75 = vset.pattern.permute.xlu0 %v107_v4 }
  0x74   :  { %v19_v5 = vpop.permute.xlu0 %18  ;;  %v27_v6 = vpop.permute.xlu1 %26 }
  0x7d   :  { %v23_v7 = vpop.permute.xlu0 %22  ;;  %v31_v9 = vpop.permute.xlu1 %30 }
  0x7e   :  { %v34_v10 = vsel %vm33_vm0, %v19_v5, %v23_v7 }
  0x7f   :  { %v36_v11 = vsel %vm35_vm1, %v34_v10, %v27_v6 }
  0x80   :  { %v38_v13 = vsel %vm37_vm2, %v36_v11, %v31_v9 }
  0x81   :  { %v43_v14 = vmul.f32 %v76_v8, %v38_v13 }
  0x83   :  { %v48_v15 = vadd.f32 %v77_v12, %v43_v14 }
  0x85   :  { %49 = vst [vmem:[#allocation2] sm:$0xff] %v48_v15 }
  0x86   :  { %60 = dma.vmem_to_hbm [thread:$0]  %s56_s18, 128, %s58_s21, [#allocation3]  }
  0x87   :  { %102 = dma.done.wait [#allocation3], 128  }
  0x88   :  { %103 = vsyncadd [#allocation3], 4294967168 }
  0x89   :  { %65 = vsyncpa [#allocation3], 1 }

</bundles_post_ra>
